<compile_context>
chip_gen: v7x
topology: tpu7x:2x2x1
jax: 0.10.0
libtpu: 0.0.40
codegen_flags: <defaults>
</compile_context>

<pallas_src>
import math

import jax
import jax.numpy as jnp
from jax.experimental import pallas as pl
from jax.experimental.pallas import tpu as pltpu


# ----------------------------- Pallas kernel -------------------------------- #
def multiin_kernel(
    xT_ref,                                   # (D_in, tile_b)  feature-major
    wb1_ref, bb1_ref, wb2_ref, bb2_ref,       # branch_main
    wt1_ref, bt1_ref, wt2_ref, bt2_ref,       # trunk_main
    wc_ref,  bc_ref,                          # connect
    wo_ref,  bo_ref,                          # output_layer
    outT_ref,                                 # (D_out, tile_b) feature-major
):
    xT = xT_ref[...].astype(jnp.float32)      # (D_in, tile_b)

    def linear_T(hT, w_ref, b_ref):
        # hT: (in, tb); W: (out, in) PyTorch layout; b: (out, 1)
        return (
            jnp.dot(w_ref[...].astype(jnp.float32), hT,
                    preferred_element_type=jnp.float32)
            + b_ref[...].astype(jnp.float32)
        )

    # branch_main: Linear -> Tanh -> Linear (no activation on last layer)
    h = jnp.tanh(linear_T(xT, wb1_ref, bb1_ref))
    y_branchT = linear_T(h, wb2_ref, bb2_ref)

    # x = y_branch * x  (elementwise)
    xmT = y_branchT * xT

    # trunk_main: (Linear -> Tanh) x 2
    h = jnp.tanh(linear_T(xmT, wt1_ref, bt1_ref))
    y_trunkT = jnp.tanh(linear_T(h, wt2_ref, bt2_ref))

    # connect(y_branch)
    ybT = linear_T(y_branchT, wc_ref, bc_ref)

    # output_layer(y_branch * y_trunk)
    yT = linear_T(ybT * y_trunkT, wo_ref, bo_ref)

    outT_ref[...] = yT.astype(outT_ref.dtype)


# ------------------------------- wrapper ------------------------------------ #
WEIGHT_NAMES = ("wb1", "bb1", "wb2", "bb2",
                "wt1", "bt1", "wt2", "bt2",
                "wc", "bc", "wo", "bo")


def multiin_forward(x, params, *, tile_b=2048):
    """x: (B, D_in) batch-major; returns (B, D_out) batch-major."""
    B, D_in = x.shape
    D_out = params["wo"].shape[0]        # wo is (out, in)
    assert tile_b % 128 == 0, "batch tile must be lane-aligned (multiple of 128)"

    # Lane-aligned effective tile; pad B so every grid step is a full dense tile.
    eff_tile = min(tile_b, 128 * pl.cdiv(B, 128))
    n_tiles = pl.cdiv(B, eff_tile)
    B_pad = eff_tile * n_tiles

    x_pad = x if B_pad == B else jnp.pad(x, ((0, B_pad - B), (0, 0)))
    xT = x_pad.T                          # (D_in, B_pad) — wrapper-side layout plumbing

    weight_args = [params[n] for n in WEIGHT_NAMES]
    # Weights are tiny and replicated: full-array block, constant index_map
    # -> fetched once, VMEM-resident across all batch tiles.
    w_specs = [pl.BlockSpec(params[n].shape, lambda i: (0, 0)) for n in WEIGHT_NAMES]

    xT_spec = pl.BlockSpec((D_in, eff_tile), lambda i: (0, i))
    outT_spec = pl.BlockSpec((D_out, eff_tile), lambda i: (0, i))

    outT = pl.pallas_call(
        multiin_kernel,
        out_shape=jax.ShapeDtypeStruct((D_out, B_pad), x.dtype),
        grid_spec=pl.GridSpec(
            grid=(n_tiles,),
            in_specs=[xT_spec] + w_specs,
            out_specs=outT_spec,
        ),
        compiler_params=pltpu.CompilerParams(
            dimension_semantics=("parallel",),   # batch tiles are independent
        ),
    )(xT, *weight_args)

    return outT.T[:B]                      # back to batch-major, drop padding


# --------------------------- parameter init ---------------------------------- #
def xavier_normal(key, fan_in, fan_out, gain=1.0):
    # nn.init.xavier_normal_ : std = gain * sqrt(2 / (fan_in + fan_out))
    # PyTorch Linear weight layout: (out, in) — kept as-is (no pre-transpose).
    std = gain * math.sqrt(2.0 / (fan_in + fan_out))
    return std * jax.random.normal(key, (fan_out, fan_in), dtype=jnp.float32)


def init_params(key, trunk_layers, branch_layers):
    assert trunk_layers[0] == branch_layers[-1]
    assert trunk_layers[0] == branch_layers[0]
    depth_trunk = len(trunk_layers) - 1
    depth_branch = len(branch_layers) - 1
    assert depth_branch == 2, "script configured for branch = [D, H, D]"
    assert depth_trunk == 4, "script configured for trunk = [D, H, H, H, O]"

    keys = iter(jax.random.split(key, 8))
    p = {}

    # branch_main: Linear+Tanh, then final Linear
    p["wb1"] = xavier_normal(next(keys), branch_layers[0], branch_layers[1])
    p["bb1"] = jnp.zeros((branch_layers[1], 1), jnp.float32)
    p["wb2"] = xavier_normal(next(keys), branch_layers[1], branch_layers[2])
    p["bb2"] = jnp.zeros((branch_layers[2], 1), jnp.float32)

    # trunk_main: (Linear -> Tanh) x (depth_trunk - 2)
    p["wt1"] = xavier_normal(next(keys), trunk_layers[0], trunk_layers[1])
    p["bt1"] = jnp.zeros((trunk_layers[1], 1), jnp.float32)
    p["wt2"] = xavier_normal(next(keys), trunk_layers[1], trunk_layers[2])
    p["bt2"] = jnp.zeros((trunk_layers[2], 1), jnp.float32)

    # connect: Linear(branch[-1] -> trunk[-2])
    p["wc"] = xavier_normal(next(keys), branch_layers[-1], trunk_layers[-2])
    p["bc"] = jnp.zeros((trunk_layers[-2], 1), jnp.float32)

    # output_layer: Linear(trunk[-2] -> trunk[-1])
    p["wo"] = xavier_normal(next(keys), trunk_layers[-2], trunk_layers[-1])
    p["bo"] = jnp.zeros((trunk_layers[-1], 1), jnp.float32)
    return p


# ------------------------ pure-JAX reference (check) ------------------------- #
def reference_forward(x, p):
    lin = lambda h, w, b: h @ w.T + b.T     # standard batch-major Linear
    h = jnp.tanh(lin(x, p["wb1"], p["bb1"]))
    y_branch = lin(h, p["wb2"], p["bb2"])
    xm = y_branch * x
    h = jnp.tanh(lin(xm, p["wt1"], p["bt1"]))
    y_trunk = jnp.tanh(lin(h, p["wt2"], p["bt2"]))
    yb = lin(y_branch, p["wc"], p["bc"])
    return lin(yb * y_trunk, p["wo"], p["bo"])


if __name__ == "__main__":
    trunk_layers = [32, 32, 32, 32, 16]
    branch_layers = [32, 32, 32]
    B = 300  # deliberately NOT a multiple of 128: exercises padding + a 3-step parallel grid

    key = jax.random.PRNGKey(0)
    kx, kp = jax.random.split(key)
    x = jax.random.normal(kx, (B, trunk_layers[0]), dtype=jnp.float32)
    params = init_params(kp, trunk_layers, branch_layers)

    out = multiin_forward(x, params, tile_b=128)   # small tile for the small demo batch
    out = jax.block_until_ready(out)

    ref = reference_forward(x, params)
    assert out.shape == (B, trunk_layers[-1])
    assert jnp.allclose(out, ref, atol=1e-5, rtol=1e-5), "mismatch vs JAX reference"

    print("KERNEL_OK")
</pallas_src>

<mosaic_0001>
module attributes {stable_mosaic.version = 11 : i64} {
  func.func @multiin_kernel(%arg0: i32, %arg1: memref<32x128xf32, #tpu.memory_space<vmem>>, %arg2: memref<32x32xf32, #tpu.memory_space<vmem>>, %arg3: memref<32x1xf32, #tpu.memory_space<vmem>>, %arg4: memref<32x32xf32, #tpu.memory_space<vmem>>, %arg5: memref<32x1xf32, #tpu.memory_space<vmem>>, %arg6: memref<32x32xf32, #tpu.memory_space<vmem>>, %arg7: memref<32x1xf32, #tpu.memory_space<vmem>>, %arg8: memref<32x32xf32, #tpu.memory_space<vmem>>, %arg9: memref<32x1xf32, #tpu.memory_space<vmem>>, %arg10: memref<32x32xf32, #tpu.memory_space<vmem>>, %arg11: memref<32x1xf32, #tpu.memory_space<vmem>>, %arg12: memref<16x32xf32, #tpu.memory_space<vmem>>, %arg13: memref<16x1xf32, #tpu.memory_space<vmem>>, %arg14: memref<16x128xf32, #tpu.memory_space<vmem>>) attributes {dimension_semantics = [#tpu.dimension_semantics<parallel>], iteration_bounds = array<i64: 3>, scalar_prefetch = 0 : i64, scratch_operands = 0 : i64, tpu.core_type = #tpu.core_type<tc>, window_params = [{transform_indices = @transform_0, window_bounds = array<i64: 32, 128>}, {pipeline_mode = #tpu.pipeline_mode<synchronous>, transform_indices = @transform_1, window_bounds = array<i64: 32, 32>}, {pipeline_mode = #tpu.pipeline_mode<synchronous>, transform_indices = @transform_2, window_bounds = array<i64: 32, 1>}, {pipeline_mode = #tpu.pipeline_mode<synchronous>, transform_indices = @transform_3, window_bounds = array<i64: 32, 32>}, {pipeline_mode = #tpu.pipeline_mode<synchronous>, transform_indices = @transform_4, window_bounds = array<i64: 32, 1>}, {pipeline_mode = #tpu.pipeline_mode<synchronous>, transform_indices = @transform_5, window_bounds = array<i64: 32, 32>}, {pipeline_mode = #tpu.pipeline_mode<synchronous>, transform_indices = @transform_6, window_bounds = array<i64: 32, 1>}, {pipeline_mode = #tpu.pipeline_mode<synchronous>, transform_indices = @transform_7, window_bounds = array<i64: 32, 32>}, {pipeline_mode = #tpu.pipeline_mode<synchronous>, transform_indices = @transform_8, window_bounds = array<i64: 32, 1>}, {pipeline_mode = #tpu.pipeline_mode<synchronous>, transform_indices = @transform_9, window_bounds = array<i64: 32, 32>}, {pipeline_mode = #tpu.pipeline_mode<synchronous>, transform_indices = @transform_10, window_bounds = array<i64: 32, 1>}, {pipeline_mode = #tpu.pipeline_mode<synchronous>, transform_indices = @transform_11, window_bounds = array<i64: 16, 32>}, {pipeline_mode = #tpu.pipeline_mode<synchronous>, transform_indices = @transform_12, window_bounds = array<i64: 16, 1>}, {transform_indices = @transform_13, window_bounds = array<i64: 16, 128>}]} {
    %c0 = arith.constant 0 : index
    %c0_0 = arith.constant 0 : index
    %0 = vector.load %arg1[%c0, %c0_0] : memref<32x128xf32, #tpu.memory_space<vmem>>, vector<32x128xf32>
    %c0_1 = arith.constant 0 : index
    %c0_2 = arith.constant 0 : index
    %1 = vector.load %arg2[%c0_1, %c0_2] : memref<32x32xf32, #tpu.memory_space<vmem>>, vector<32x32xf32>
    %cst = arith.constant dense<0.000000e+00> : vector<32x128xf32>
    %2 = tpu.matmul %1, %0, %cst {dimension_numbers = #tpu.dot_dimension_numbers<[1], [0], [0], [1], [0, 0, 1, 1], [], []>} : vector<32x32xf32>, vector<32x128xf32>, vector<32x128xf32> -> vector<32x128xf32>
    %c0_3 = arith.constant 0 : index
    %c0_4 = arith.constant 0 : index
    %3 = vector.load %arg3[%c0_3, %c0_4] : memref<32x1xf32, #tpu.memory_space<vmem>>, vector<32x1xf32>
    %4 = vector.broadcast %3 : vector<32x1xf32> to vector<32x128xf32>
    %5 = arith.addf %2, %4 : vector<32x128xf32>
    %6 = math.tanh %5 : vector<32x128xf32>
    %c0_5 = arith.constant 0 : index
    %c0_6 = arith.constant 0 : index
    %7 = vector.load %arg4[%c0_5, %c0_6] : memref<32x32xf32, #tpu.memory_space<vmem>>, vector<32x32xf32>
    %cst_7 = arith.constant dense<0.000000e+00> : vector<32x128xf32>
    %8 = tpu.matmul %7, %6, %cst_7 {dimension_numbers = #tpu.dot_dimension_numbers<[1], [0], [0], [1], [0, 0, 1, 1], [], []>} : vector<32x32xf32>, vector<32x128xf32>, vector<32x128xf32> -> vector<32x128xf32>
    %c0_8 = arith.constant 0 : index
    %c0_9 = arith.constant 0 : index
    %9 = vector.load %arg5[%c0_8, %c0_9] : memref<32x1xf32, #tpu.memory_space<vmem>>, vector<32x1xf32>
    %10 = vector.broadcast %9 : vector<32x1xf32> to vector<32x128xf32>
    %11 = arith.addf %8, %10 : vector<32x128xf32>
    %12 = arith.mulf %11, %0 : vector<32x128xf32>
    %c0_10 = arith.constant 0 : index
    %c0_11 = arith.constant 0 : index
    %13 = vector.load %arg6[%c0_10, %c0_11] : memref<32x32xf32, #tpu.memory_space<vmem>>, vector<32x32xf32>
    %cst_12 = arith.constant dense<0.000000e+00> : vector<32x128xf32>
    %14 = tpu.matmul %13, %12, %cst_12 {dimension_numbers = #tpu.dot_dimension_numbers<[1], [0], [0], [1], [0, 0, 1, 1], [], []>} : vector<32x32xf32>, vector<32x128xf32>, vector<32x128xf32> -> vector<32x128xf32>
    %c0_13 = arith.constant 0 : index
    %c0_14 = arith.constant 0 : index
    %15 = vector.load %arg7[%c0_13, %c0_14] : memref<32x1xf32, #tpu.memory_space<vmem>>, vector<32x1xf32>
    %16 = vector.broadcast %15 : vector<32x1xf32> to vector<32x128xf32>
    %17 = arith.addf %14, %16 : vector<32x128xf32>
    %18 = math.tanh %17 : vector<32x128xf32>
    %c0_15 = arith.constant 0 : index
    %c0_16 = arith.constant 0 : index
    %19 = vector.load %arg8[%c0_15, %c0_16] : memref<32x32xf32, #tpu.memory_space<vmem>>, vector<32x32xf32>
    %cst_17 = arith.constant dense<0.000000e+00> : vector<32x128xf32>
    %20 = tpu.matmul %19, %18, %cst_17 {dimension_numbers = #tpu.dot_dimension_numbers<[1], [0], [0], [1], [0, 0, 1, 1], [], []>} : vector<32x32xf32>, vector<32x128xf32>, vector<32x128xf32> -> vector<32x128xf32>
    %c0_18 = arith.constant 0 : index
    %c0_19 = arith.constant 0 : index
    %21 = vector.load %arg9[%c0_18, %c0_19] : memref<32x1xf32, #tpu.memory_space<vmem>>, vector<32x1xf32>
    %22 = vector.broadcast %21 : vector<32x1xf32> to vector<32x128xf32>
    %23 = arith.addf %20, %22 : vector<32x128xf32>
    %24 = math.tanh %23 : vector<32x128xf32>
    %c0_20 = arith.constant 0 : index
    %c0_21 = arith.constant 0 : index
    %25 = vector.load %arg10[%c0_20, %c0_21] : memref<32x32xf32, #tpu.memory_space<vmem>>, vector<32x32xf32>
    %cst_22 = arith.constant dense<0.000000e+00> : vector<32x128xf32>
    %26 = tpu.matmul %25, %11, %cst_22 {dimension_numbers = #tpu.dot_dimension_numbers<[1], [0], [0], [1], [0, 0, 1, 1], [], []>} : vector<32x32xf32>, vector<32x128xf32>, vector<32x128xf32> -> vector<32x128xf32>
    %c0_23 = arith.constant 0 : index
    %c0_24 = arith.constant 0 : index
    %27 = vector.load %arg11[%c0_23, %c0_24] : memref<32x1xf32, #tpu.memory_space<vmem>>, vector<32x1xf32>
    %28 = vector.broadcast %27 : vector<32x1xf32> to vector<32x128xf32>
    %29 = arith.addf %26, %28 : vector<32x128xf32>
    %30 = arith.mulf %29, %24 : vector<32x128xf32>
    %c0_25 = arith.constant 0 : index
    %c0_26 = arith.constant 0 : index
    %31 = vector.load %arg12[%c0_25, %c0_26] : memref<16x32xf32, #tpu.memory_space<vmem>>, vector<16x32xf32>
    %cst_27 = arith.constant dense<0.000000e+00> : vector<16x128xf32>
    %32 = tpu.matmul %31, %30, %cst_27 {dimension_numbers = #tpu.dot_dimension_numbers<[1], [0], [0], [1], [0, 0, 1, 1], [], []>} : vector<16x32xf32>, vector<32x128xf32>, vector<16x128xf32> -> vector<16x128xf32>
    %c0_28 = arith.constant 0 : index
    %c0_29 = arith.constant 0 : index
    %33 = vector.load %arg13[%c0_28, %c0_29] : memref<16x1xf32, #tpu.memory_space<vmem>>, vector<16x1xf32>
    %34 = vector.broadcast %33 : vector<16x1xf32> to vector<16x128xf32>
    %35 = arith.addf %32, %34 : vector<16x128xf32>
    %c0_30 = arith.constant 0 : index
    %c0_31 = arith.constant 0 : index
    %36 = vector.load %arg14[%c0_30, %c0_31] : memref<16x128xf32, #tpu.memory_space<vmem>>, vector<16x128xf32>
    tpu.vector_store %arg14[%c0_30, %c0_31], %35 {strides = array<i32>} : memref<16x128xf32, #tpu.memory_space<vmem>>, vector<16x128xf32>,
    return
  }
  func.func @transform_0(%arg0: i32) -> (i32, i32) {
    %c0_i32 = arith.constant 0 : i32
    %c0_i32_0 = arith.constant 0 : i32
    return %c0_i32, %arg0 : i32, i32
  }
  func.func @transform_1(%arg0: i32) -> (i32, i32) {
    %c0_i32 = arith.constant 0 : i32
    %c0_i32_0 = arith.constant 0 : i32
    %c0_i32_1 = arith.constant 0 : i32
    return %c0_i32, %c0_i32_0 : i32, i32
  }
  func.func @transform_2(%arg0: i32) -> (i32, i32) {
    %c0_i32 = arith.constant 0 : i32
    %c0_i32_0 = arith.constant 0 : i32
    %c0_i32_1 = arith.constant 0 : i32
    return %c0_i32, %c0_i32_0 : i32, i32
  }
  func.func @transform_3(%arg0: i32) -> (i32, i32) {
    %c0_i32 = arith.constant 0 : i32
    %c0_i32_0 = arith.constant 0 : i32
    %c0_i32_1 = arith.constant 0 : i32
    return %c0_i32, %c0_i32_0 : i32, i32
  }
  func.func @transform_4(%arg0: i32) -> (i32, i32) {
    %c0_i32 = arith.constant 0 : i32
    %c0_i32_0 = arith.constant 0 : i32
    %c0_i32_1 = arith.constant 0 : i32
    return %c0_i32, %c0_i32_0 : i32, i32
  }
  func.func @transform_5(%arg0: i32) -> (i32, i32) {
    %c0_i32 = arith.constant 0 : i32
    %c0_i32_0 = arith.constant 0 : i32
    %c0_i32_1 = arith.constant 0 : i32
    return %c0_i32, %c0_i32_0 : i32, i32
  }
  func.func @transform_6(%arg0: i32) -> (i32, i32) {
    %c0_i32 = arith.constant 0 : i32
    %c0_i32_0 = arith.constant 0 : i32
    %c0_i32_1 = arith.constant 0 : i32
    return %c0_i32, %c0_i32_0 : i32, i32
  }
  func.func @transform_7(%arg0: i32) -> (i32, i32) {
    %c0_i32 = arith.constant 0 : i32
    %c0_i32_0 = arith.constant 0 : i32
    %c0_i32_1 = arith.constant 0 : i32
    return %c0_i32, %c0_i32_0 : i32, i32
  }
  func.func @transform_8(%arg0: i32) -> (i32, i32) {
    %c0_i32 = arith.constant 0 : i32
    %c0_i32_0 = arith.constant 0 : i32
    %c0_i32_1 = arith.constant 0 : i32
    return %c0_i32, %c0_i32_0 : i32, i32
  }
  func.func @transform_9(%arg0: i32) -> (i32, i32) {
    %c0_i32 = arith.constant 0 : i32
    %c0_i32_0 = arith.constant 0 : i32
    %c0_i32_1 = arith.constant 0 : i32
    return %c0_i32, %c0_i32_0 : i32, i32
  }
  func.func @transform_10(%arg0: i32) -> (i32, i32) {
    %c0_i32 = arith.constant 0 : i32
    %c0_i32_0 = arith.constant 0 : i32
    %c0_i32_1 = arith.constant 0 : i32
    return %c0_i32, %c0_i32_0 : i32, i32
  }
  func.func @transform_11(%arg0: i32) -> (i32, i32) {
    %c0_i32 = arith.constant 0 : i32
    %c0_i32_0 = arith.constant 0 : i32
    %c0_i32_1 = arith.constant 0 : i32
    return %c0_i32, %c0_i32_0 : i32, i32
  }
  func.func @transform_12(%arg0: i32) -> (i32, i32) {
    %c0_i32 = arith.constant 0 : i32
    %c0_i32_0 = arith.constant 0 : i32
    %c0_i32_1 = arith.constant 0 : i32
    return %c0_i32, %c0_i32_0 : i32, i32
  }
  func.func @transform_13(%arg0: i32) -> (i32, i32) {
    %c0_i32 = arith.constant 0 : i32
    %c0_i32_0 = arith.constant 0 : i32
    return %c0_i32, %arg0 : i32, i32
  }
}

</mosaic_0001>

<bundles_post_ra>
// kernel: tpu_custom_call.1
= control target key start
LH: loop header
LB: loop body
LE: loop exit
PB: predicated region body
PF: predicated region fallthrough
CT: control target
= control target key end

     0   :  { %s2210_s0 = inlined_call_operand.vmem [shape: f32[32,384], index: 0, kind: input, shape index: {}]   ;;  %s2211_s1 = inlined_call_operand.vmem [shape: f32[32,32], index: 1, kind: input, shape index: {}]   ;;  %s2212_s2 = inlined_call_operand.vmem [shape: f32[32,1], index: 2, kind: input, shape index: {}]   ;;  %s2213_s3 = inlined_call_operand.vmem [shape: f32[32,32], index: 3, kind: input, shape index: {}]   ;;  %s2214_s4 = inlined_call_operand.vmem [shape: f32[32,1], index: 4, kind: input, shape index: {}]   ;;  %s2215_s5 = inlined_call_operand.vmem [shape: f32[32,32], index: 5, kind: input, shape index: {}]   ;;  %s2216_s6 = inlined_call_operand.vmem [shape: f32[32,1], index: 6, kind: input, shape index: {}]   ;;  %s2217_s7 = inlined_call_operand.hbm [shape: f32[32,32], index: 7, kind: input, shape index: {}]   ;;  %s2218_s8 = inlined_call_operand.vmem [shape: f32[32,1], index: 8, kind: input, shape index: {}]   ;;  %s2219_s9 = inlined_call_operand.hbm [shape: f32[32,32], index: 9, kind: input, shape index: {}]   ;;  %s2220_s10 = inlined_call_operand.vmem [shape: f32[32,1], index: 10, kind: input, shape index: {}]   ;;  %s2221_s11 = inlined_call_operand.vmem [shape: f32[16,32], index: 11, kind: input, shape index: {}]   ;;  %s2222_s12 = inlined_call_operand.vmem [shape: f32[16,1], index: 12, kind: input, shape index: {}]   ;;  %s2223_s13 = inlined_call_operand.hbm [shape: f32[16,384], index: 13, kind: output, shape index: {}]  }
   0x1   :  { %2236 = sst [smem:[#allocation17_spill]] %s2215_s5 }
   0x2   :  { %2237 = sst [smem:[#allocation18_spill]] %s2221_s11 }
   0x3   :  { %2238 = sst [smem:[#allocation19_spill]] %s2223_s13 }
   0x4   :  { %18 = vsyncpa [#allocation4], 0 }
   0x5   :  { %19 = vsyncpa [#allocation7], 0 }
   0x6   :  { %20 = vsyncpa [#allocation5], 0 }
   0x7   :  { %22 = vsyncpa [#allocation5 + $0x1], 0  ;;  %s1877_s25 = smov 0   ;;  %s1879_s26 = smov 0  }
   0x8   :  { %s1881_s27 = smov 0   ;;  %s1883_s28 = smov 0  }
   0x9 LB: > { %2239 = sst [smem:[#allocation12_spill]] %s1784_s25  ;;  %s1898_s29 = sadd.s32 4294967295, %s1796_s28   ;;  %s1796_s28 = sphi %s1883_s28, %s2263_s28   ;;  %s1792_s27 = sphi %s1881_s27, %s2267_s27   ;;  %s1788_s26 = sphi %s1879_s26, %s2266_s26   ;;  %s1784_s25 = sphi %s1877_s25, %s2265_s25  }
   0xa   : > { %s1365_s30 = sadd.s32 4294967294, %s1796_s28   ;;  %s1902_s14 = sadd.s32 1, %s1796_s28  }
   0xb   : > { %2240 = sst [smem:[#allocation13_spill]] %s1902_s14  ;;  %s35_s15 = sadd.s32 1, %s1792_s27 }
   0xc   : > { %s32_s16 = ssub.s32 %s1796_s28, %s1902_s14  ;;  %p42_p0 = scmp.ne.s32.totalorder %s1792_s27, %s1788_s26 }
   0xd   : > { %p33_p1 = scmp.eq.s32.totalorder %s32_s16, 0  ;;  %p43_p2 = scmp.eq.s32.totalorder %s1796_s28, 0 }
   0xe   : > { %p324_p3 = scmp.eq.s32.totalorder %s1898_s29, 2  ;;  %p329_p4 = scmp.ne.s32.totalorder %s1788_s26, %s1784_s25 }
   0xf   : > { %s1914_s17 = scalar_select %p33_p1, %s1792_s27, %s35_s15  }
  0x10   : > { %p1916_p5 = por %p43_p2, %p42_p0  ;;  %p1920_p6 = por %p324_p3, %p42_p0 }
  0x11   : > { %2241 = sst [smem:[#allocation14_spill]] %s1914_s17  ;;  %p330_p7 = scmp.eq.s32.totalorder %s1365_s30, 2 }
  0x12   : > { %s2242_s18 = scalar_select %p1916_p5, 1, 0 }
  0x13   : > { %s2243_s19 = scalar_select %p1920_p6, 1, 0 }
  0x14   : > { %p1366_p8 = scmp.ge.s32.totalorder %s1796_s28, 1  ;;  %p337_p9 = scmp.lt.s32.totalorder %s1796_s28, 4 }
  0x15   : > { %2244 = sst [smem:[#allocation15_spill]] %s2243_s19  ;;  %p1926_p10 = por %p330_p7, %p329_p4 }
  0x16   : > { %p2229_p11 = scmp.eq.s32.totalorder %s1898_s29, 0  ;;  %p1931_p12 = pnand %p1366_p8, %p337_p9 }
  0x17   : > { %s2245_s20 = scalar_select %p1926_p10, 1, 0 }
  0x18   : > { %s2247_s21 = scalar_select %p1931_p12, 1, 0 }
  0x19   : > { %2246 = sst [smem:[#allocation16_spill]] %s2245_s20  ;;  %s1798_s22 = smov [#allocation3]  }
  0x1a   : > { %s367_s23 = sshll.u32 %s1798_s22, 4  ;;  %p1588_p13 = pneg %p1931_p12  ;;  %s368_s23 = int_to_ptr.vmem [resolvable:$true] %s367_s23 }
  0x1b   : > { %s1799_s30 = smov [#allocation6]   ;;  %s1670_s14 = scalar_lea.hbm %s2217_s7, 512 }
  0x1c   : > { %p1939_p0 = pnand %p2229_p11, %p1588_p13  ;;  %s383_s15 = sshll.u32 %s1799_s30, 4  ;;  %s1943_s15 = int_to_ptr.vmem [resolvable:$true] %s383_s15 }
  0x1d   : > { %p1671_p1 = scmp.ne.s32.totalorder %s2217_s7, %s1670_s14  ;;  %p1677_p7 = scmp.lt.u32.totalorder %s1670_s14, %s2217_s7 }
  0x1e   : > { %p1672_p2 = pneg %p1939_p0 }
  0x20   : > { %p1673_p3 = pnand %p1672_p2, %p1671_p1 }
  0x22   : > { %p1674_p4 = pneg %p1673_p3 }
  0x24   : > { %p1679_p8 = pnand %p1677_p7, %p1674_p4 }
  0x26   : > { %1682 = shalt.err (!%p1679_p8)
}
  0x27   : > { %s1683_s30 = scalar_lea.vmem %s368_s23, 512  ;;  %p1691_p10 = scmp.lt.s32.totalorder %s368_s23, %s368_s23 }
  0x28   : > { %p1684_p9 = scmp.ne.s32.totalorder %s368_s23, %s1683_s30  ;;  %p1692_p6 = scmp.lt.s32.totalorder %s1683_s30, %s1683_s30 }
  0x2a   : > { %p1686_p13 = pnand %p1684_p9, %p1672_p2  ;;  %p1693_p12 = por %p1692_p6, %p1691_p10 }
  0x2c   : > { %p1687_p11 = pneg %p1686_p13 }
  0x2e   : > { %p1694_p5 = pnand %p1693_p12, %p1687_p11 }
  0x30   : > { %1697 = shalt.err (!%p1694_p5)
}
  0x31   : > { %s1800_s17 = smov 128   ;;  %s1801_s20 = smov 8  }
  0x32   : > { %1591 = dma.hbm_to_vmem [thread:$0]  (!%p1939_p0), %s2217_s7, 512, %s368_s23, [#allocation4], %s1800_s17, %s1800_s17, %s1801_s20  }
  0x33   : > { %s1698_s22 = scalar_lea.hbm %s2219_s9, 512 }
  0x34   : > { %p1699_p1 = scmp.ne.s32.totalorder %s2219_s9, %s1698_s22  ;;  %p1705_p10 = scmp.lt.u32.totalorder %s1698_s22, %s2219_s9 }
  0x36   : > { %p1701_p5 = pnand %p1699_p1, %p1672_p2 }
  0x38   : > { %p1702_p6 = pneg %p1701_p5 }
  0x3a   : > { %p1707_p11 = pnand %p1705_p10, %p1702_p6 }
  0x3c   : > { %1710 = shalt.err (!%p1707_p11)
}
  0x3d   : > { %s1711_s23 = scalar_lea.vmem %s1943_s15, 512  ;;  %p1719_p7 = scmp.lt.s32.totalorder %s1943_s15, %s1943_s15 }
  0x3e   : > { %p1712_p12 = scmp.ne.s32.totalorder %s1943_s15, %s1711_s23  ;;  %p1720_p8 = scmp.lt.s32.totalorder %s1711_s23, %s1711_s23 }
  0x40   : > { %p1714_p3 = pnand %p1712_p12, %p1672_p2  ;;  %p1721_p9 = por %p1720_p8, %p1719_p7 }
  0x42   : > { %p1715_p4 = pneg %p1714_p3 }
  0x44   : > { %p1722_p13 = pnand %p1721_p9, %p1715_p4 }
  0x46   : > { %1725 = shalt.err (!%p1722_p13)
}
  0x47   : > { %1594 = dma.hbm_to_vmem [thread:$0]  (!%p1939_p0), %s2219_s9, 512, %s1943_s15, [#allocation7], %s1800_s17, %s1800_s17, %s1801_s20  }
  0x48   : > { %p1369_p1 = scmp.ge.s32.totalorder %s1796_s28, 3 }
  0x49   : > { %p2249_p5 = scmp.ne.s32.totalorder (!%p1369_p1), %s2242_s18, 0 }
  0x4a   : > { %402 = sbr.rel (%p1369_p1) target bundleno = 88 (0x58), region = 64 }
  0x51   : > { %405 = sbr.rel (!%p2249_p5) target bundleno = 88 (0x58), region = 68  ;;  %s407_s19 = sand.u32 (%p2249_p5), 1, %s1792_s27  }
  0x52   : > { %s1371_s13 = sshll.u32 (%p2249_p5), %s1796_s28, 3  ;;  %s1370_s25 = sshll.u32 (%p2249_p5), %s407_s19, 5 }
  0x53   : > { %s411_s24 = scalar_lea.vmem (%p2249_p5), %s2210_s0, %s1371_s13  ;;  %s409_s22 = scalar_lea.vmem (%p2249_p5), [#allocation2], %s1370_s25 }
  0x54   : > { %v445_v0 = vld [vmem:[%s411_s24] sm:$0xff] (%p2249_p5)  ;;  %v447_v1 = vld [vmem:[%s411_s24 + $0x18] sm:$0xff] (%p2249_p5)  ;;  %v449_v2 = vld [vmem:[%s411_s24 + $0x30] sm:$0xff] (%p2249_p5) }
  0x55   : > { %446 = vst [vmem:[%s409_s22] sm:$0xff] (%p2249_p5), %v445_v0  ;;  %448 = vst [vmem:[%s409_s22 + $0x8] sm:$0xff] (%p2249_p5), %v447_v1  ;;  %v451_v3 = vld [vmem:[%s411_s24 + $0x48] sm:$0xff] (%p2249_p5) }
  0x56   : > { %450 = vst [vmem:[%s409_s22 + $0x10] sm:$0xff] (%p2249_p5), %v449_v2  ;;  %452 = vst [vmem:[%s409_s22 + $0x18] sm:$0xff] (%p2249_p5), %v451_v3 }
  0x58 PF: > { %p2250_p0 = scmp.ne.s32.totalorder %s2247_s21, 0 }
  0x59   : > { %s2003_s18 = sand.u32 (!%p2250_p0), 1, %s1788_s26   ;;  %p2251_p2 = scmp.eq.s32.totalorder (!%p2250_p0), %s1898_s29, 0 }
  0x5a   : > { %461 = sbr.rel (%p2250_p0) target bundleno = 1280 (0x500), region = 106  ;;  %s1373_s15 = sshll.u32 (!%p2250_p0), %s2003_s18, 5 }
  0x5b   : > { %s466_s17 = scalar_lea.vmem (!%p2250_p0), [#allocation2], %s1373_s15 }
  0x61   : > { %1771 = dma.done.wait (%p2251_p2), [#allocation4], 512   ;;  %p2252_p6 = pmov %p2251_p2 }
  0x62   : > { %p2253_p10 = pmov %p2251_p2 }
  0x63   : > { %1773 = vsyncadd (%p2252_p6), [#allocation4], 4294966784 }
  0x64   : > { %1775 = dma.done.wait (%p2253_p10), [#allocation7], 512   ;;  %p2254_p11 = pmov %p2251_p2 }
  0x65   : > { %v1802_v4 = vmov 0   ;;  %vm547_vm0 = vcmask 261120   ;;  %v2014_v5 = vld [vmem:[%s466_s17] sm:$0xff]  ;;  %v2016_v6 = vld [vmem:[%s466_s17 + $0x8] sm:$0xff]  ;;  %v2018_v7 = vld [vmem:[%s466_s17 + $0x10] sm:$0xff]  ;;  %s2255_s30 = sld [smem:[#allocation17_spill]] }
  0x66   : > { %1777 = vsyncadd (%p2254_p11), [#allocation7], 4294966784  ;;  %1644 = vset.pattern.permute.xlu0 %v1802_v4  ;;  %1645 = vset.pattern.permute.xlu1 %v1802_v4  ;;  %v1530_v8 = vpack.c.bf16 %v2016_v6, %v2014_v5  ;;  %v2022_v9 = vld [vmem:[%s466_s17 + $0x18] sm:$0xff]  ;;  %v519_v10 = vld [vmem:[%s2211_s1] sm:$0xff]  ;;  %s2256_s24 = sld [smem:[#allocation18_spill]]  ;;  %s1376_s17 = sshll.u32 %s2003_s18, 4 }
  0x67   : > { %v1534_v11 = vpack.c.bf16 %v2022_v9, %v2018_v7  ;;  %1457 = vmatprep.mubr.msk.f32.mxu0 %vm547_vm0, %v519_v10  ;;  %v523_v12 = vld [vmem:[%s2212_s2] sm:$0xff]  ;;  %v525_v13 = vld [vmem:[%s2212_s2 + $0x10] sm:$0xff]  ;;  %v524_v14 = vld [vmem:[%s2212_s2 + $0x8] sm:$0xff]  ;;  %s514_s21 = scalar_lea.vmem [#allocation8], %s1376_s17  ;;  %s2257_s20 = sld [smem:[#allocation15_spill]] }
  0x68   : > { %1531 = vmatprep.subr.bf16.mxu0 %v1530_v8  ;;  %529 = vperm.xlu0 %1644, %v523_v12   ;;  %v526_v15 = vld [vmem:[%s2212_s2 + $0x18] sm:$0xff]  ;;  %v520_v16 = vld [vmem:[%s2211_s1 + $0x8] sm:$0xff]  ;;  %v653_v17 = vld [vmem:[%s2214_s4] sm:$0xff]  ;;  %s1275_s23 = sshll.u32 %s514_s21, 4  ;;  %s1400_s5 = sshll.u32 %s1898_s29, 7  ;;  %s2162_s23 = int_to_ptr.vmem [resolvable:$true] %s1275_s23 }
  0x69   : > { %1533 = vmatpush3.bf16.msra.mxu0 %v1530_v8  ;;  %539 = vperm.xlu1 %1645, %v525_v13   ;;  %v521_v18 = vld [vmem:[%s2211_s1 + $0x10] sm:$0xff]  ;;  %v654_v19 = vld [vmem:[%s2214_s4 + $0x8] sm:$0xff]  ;;  %v522_v20 = vld [vmem:[%s2211_s1 + $0x18] sm:$0xff]  ;;  %s2258_s13 = sld [smem:[#allocation19_spill]]  ;;  %s1263_s14 = scalar_lea.sflag [#allocation5], %s2003_s18 }
  0x6a   : > { %1535 = vmatprep.subr.bf16.mxu0 %v1534_v11  ;;  %v655_v21 = vld [vmem:[%s2214_s4 + $0x10] sm:$0xff]  ;;  %v656_v22 = vld [vmem:[%s2214_s4 + $0x18] sm:$0xff]  ;;  %v782_v23 = vld [vmem:[%s2216_s6] sm:$0xff]  ;;  %s1726_s29 = scalar_lea.vmem %s2162_s23, 256  ;;  %s1803_s16 = smov [#allocation8]  }
  0x6b   : > { %v783_v24 = vld [vmem:[%s2216_s6 + $0x8] sm:$0xff]  ;;  %v784_v25 = vld [vmem:[%s2216_s6 + $0x10] sm:$0xff]  ;;  %v785_v26 = vld [vmem:[%s2216_s6 + $0x18] sm:$0xff]  ;;  %p1727_p12 = scmp.ne.s32.totalorder %s2162_s23, %s1726_s29  ;;  %s1730_s22 = sshll.u32 %s1803_s16, 4  ;;  %s1731_s22 = int_to_ptr.vmem [resolvable:$false] %s1730_s22 }
  0x6c   : > { %534 = vperm.xlu0 %1644, %v524_v14   ;;  %v911_v27 = vld [vmem:[%s2218_s8] sm:$0xff]  ;;  %v912_v28 = vld [vmem:[%s2218_s8 + $0x8] sm:$0xff]  ;;  %v913_v29 = vld [vmem:[%s2218_s8 + $0x10] sm:$0xff]  ;;  %s1732_s15 = scalar_lea.vmem %s1731_s22, 512  ;;  %p1733_p8 = scmp.lt.s32.totalorder %s2162_s23, %s1731_s22 }
  0x6d   : > { %1537 = vmatpush3.bf16.msra.mxu0 %v1534_v11  ;;  %544 = vperm.xlu1 %1645, %v526_v15   ;;  %v914_v30 = vld [vmem:[%s2218_s8 + $0x18] sm:$0xff]  ;;  %v1040_v31 = vld [vmem:[%s2220_s10] sm:$0xff]  ;;  %v1041_v32 = vld [vmem:[%s2220_s10 + $0x8] sm:$0xff]  ;;  %p2259_p3 = scmp.ne.s32.totalorder %s2257_s20, 0  ;;  %p1734_p9 = scmp.lt.s32.totalorder %s1732_s15, %s1726_s29 }
  0x6e   : > { %v1042_v33 = vld [vmem:[%s2220_s10 + $0x10] sm:$0xff]  ;;  %v1043_v34 = vld [vmem:[%s2220_s10 + $0x18] sm:$0xff]  ;;  %v1167_v35 = vld [vmem:[%s2222_s12] sm:$0xff] }
  0x6f   : > { %v1168_v36 = vld [vmem:[%s2222_s12 + $0x8] sm:$0xff]  ;;  %v649_v37 = vld [vmem:[%s2213_s3] sm:$0xff]  ;;  %v651_v57 = vld [vmem:[%s2213_s3 + $0x10] sm:$0xff]  ;;  %s2167_s25 = scalar_lea.hbm %s2258_s13, %s1400_s5  ;;  %p1728_p4 = pnand %p1727_p12, %p2259_p3 }
  0x70   : > { %1458 = vmatmul.mubr.msk.f32.vlgmr.msra.gmra.mrb[0].mxu0 %vm547_vm0, %v520_v16  ;;  %659 = vperm.xlu0 %1644, %v653_v17   ;;  %v650_v56 = vld [vmem:[%s2213_s3 + $0x8] sm:$0xff]  ;;  %v652_v58 = vld [vmem:[%s2213_s3 + $0x18] sm:$0xff]  ;;  %v778_v59 = vld [vmem:[%s2255_s30] sm:$0xff]  ;;  %p1735_p13 = por %p1734_p9, %p1733_p8 }
  0x71   : > { %1460 = vmatprep.mubr.msk.f32.mxu0 %vm547_vm0, %v521_v18  ;;  %664 = vperm.xlu1 %1645, %v654_v19   ;;  %p1729_p7 = pneg %p1728_p4 }
  0x72   : > { %1471 = vmatprep.mubr.msk.f32.mxu1 %vm547_vm0, %v649_v37 }
  0x73   : > { %p1736_p1 = pnand %p1735_p13, %p1729_p7 }
  0x74   : > { %1461 = vmatmul.mubr.msk.f32.gmra.mrb[2].mxu0 %vm547_vm0, %v522_v20  ;;  %669 = vperm.xlu0 %1644, %v655_v21   ;;  %v1037_v20 = vld [vmem:[#allocation6 + $0x8] sm:$0xff]  ;;  %v1038_v21 = vld [vmem:[#allocation6 + $0x10] sm:$0xff] }
  0x75   : > { %674 = vperm.xlu1 %1645, %v656_v22   ;;  %1485 = vmatprep.mubr.msk.f32.mxu0 %vm547_vm0, %v778_v59  ;;  %v1039_v22 = vld [vmem:[#allocation6 + $0x18] sm:$0xff] }
  0x78   : > { %788 = vperm.xlu0 %1644, %v782_v23   ;;  %v907_v23 = vld [vmem:[#allocation3] sm:$0xff] }
  0x79   : > { %793 = vperm.xlu1 %1645, %v783_v24  }
  0x7c   : > { %798 = vperm.xlu0 %1644, %v784_v25  }
  0x7d   : > { %803 = vperm.xlu1 %1645, %v785_v26  }
  0x80   : > { %917 = vperm.xlu0 %1644, %v911_v27  }
  0x81   : > { %922 = vperm.xlu1 %1645, %v912_v28  }
  0x84   : > { %927 = vperm.xlu0 %1644, %v913_v29  }
  0x85   : > { %932 = vperm.xlu1 %1645, %v914_v30  }
  0x88   : > { %1046 = vperm.xlu0 %1644, %v1040_v31  }
  0x89   : > { %1051 = vperm.xlu1 %1645, %v1041_v32  }
  0x8c   : > { %1056 = vperm.xlu0 %1644, %v1042_v33  }
  0x8d   : > { %1061 = vperm.xlu1 %1645, %v1043_v34  }
  0x90   : > { %1171 = vperm.xlu0 %1644, %v1167_v35  }
  0x91   : > { %1176 = vperm.xlu1 %1645, %v1168_v36  }
  0xe7   : > { %v530_v38 = vpop.permute.xlu0 %529 }
  0xe8   : > { %v540_v39 = vpop.permute.xlu1 %539 }
  0xeb   : > { %v535_v40 = vpop.permute.xlu0 %534 }
  0xec   : > { %v545_v45 = vpop.permute.xlu1 %544 }
  0xef   : > { %v660_v61 = vpop.permute.xlu0 %659 }
  0xf0   : > { %v665_v60 = vpop.permute.xlu1 %664 }
  0xf3   : > { %v670_v11 = vpop.permute.xlu0 %669 }
  0xf4   : > { %v675_v3 = vpop.permute.xlu1 %674 }
  0xf7   : > { %v789_v25 = vpop.permute.xlu0 %788 }
  0xf8   : > { %v794_v24 = vpop.permute.xlu1 %793 }
  0xfb   : > { %v799_v32 = vpop.permute.xlu0 %798 }
  0xfc   : > { %v804_v30 = vpop.permute.xlu1 %803 }
 0x143   : > { %v1459_v41 = vpop.f32.mrb[0].mxu0 }
 0x144   : > { %v632_v42 = vadd.f32 %v1459_v41, %v535_v40  ;;  %v626_v43 = vpop.f32.mrb[1].mxu0 }
 0x145   : > { %v627_v44 = vadd.f32 %v626_v43, %v530_v38 }
 0x146   : > { %1646 = vtanh.f32 %v632_v42 }
 0x147   : > { %1648 = vtanh.f32 %v627_v44  ;;  %v1462_v46 = vpop.f32.mrb[2].mxu0 }
 0x148   : > { %v642_v47 = vadd.f32 %v1462_v46, %v545_v45  ;;  %v636_v48 = vpop.f32.mrb[3].mxu0  ;;  %v908_v46 = vld [vmem:[#allocation3 + $0x8] sm:$0xff] }
 0x149   : > { %v637_v49 = vadd.f32 %v636_v48, %v540_v39  ;;  %v910_v48 = vld [vmem:[#allocation3 + $0x18] sm:$0xff] }
 0x14a   : > { %1650 = vtanh.f32 %v642_v47  ;;  %v909_v47 = vld [vmem:[#allocation3 + $0x10] sm:$0xff] }
 0x14b   : > { %1652 = vtanh.f32 %v637_v49  ;;  %v1165_v49 = vld [vmem:[%s2256_s24] sm:$0xff] }
 0x150   : > { %v1647_v50 = vpop.eup %1646 }
 0x151   : > { %v1649_v51 = vpop.eup %1648 }
 0x152   : > { %v1538_v52 = vpack.c.bf16 %v1647_v50, %v1649_v51  ;;  %v923_v50 = vpop.permute.xlu1 %922  ;;  %v918_v51 = vpop.permute.xlu0 %917 }
 0x154   : > { %v1651_v53 = vpop.eup %1650  ;;  %1539 = vmatprep.subr.bf16.mxu1 %v1538_v52 }
 0x155   : > { %v1653_v54 = vpop.eup %1652  ;;  %1541 = vmatpush3.bf16.msra.mxu1 %v1538_v52 }
 0x156   : > { %v1542_v55 = vpack.c.bf16 %v1651_v53, %v1653_v54 }
 0x158   : > { %1543 = vmatprep.subr.bf16.mxu1 %v1542_v55 }
 0x159   : > { %1545 = vmatpush3.bf16.msra.mxu1 %v1542_v55 }
 0x15c   : > { %1472 = vmatmul.mubr.msk.f32.vlgmr.msra.gmra.mrb[0].mxu1 %vm547_vm0, %v650_v56  ;;  %v933_v56 = vpop.permute.xlu1 %932 }
 0x15d   : > { %1474 = vmatprep.mubr.msk.f32.mxu1 %vm547_vm0, %v651_v57  ;;  %v928_v57 = vpop.permute.xlu0 %927 }
 0x160   : > { %1475 = vmatmul.mubr.msk.f32.gmra.mrb[2].mxu1 %vm547_vm0, %v652_v58 }
 0x161   : > { %1499 = vmatprep.mubr.msk.f32.mxu1 %vm547_vm0, %v907_v23 }
 0x22f   : > { %v1473_v62 = vpop.f32.mrb[0].mxu1 }
 0x230   : > { %v761_v63 = vadd.f32 %v1473_v62, %v665_v60  ;;  %v755_v0 = vpop.f32.mrb[1].mxu1  ;;  %v1052_v62 = vpop.permute.xlu1 %1051 }
 0x231   : > { %v756_v1 = vadd.f32 %v755_v0, %v660_v61 }
 0x232   : > { %v775_v2 = vmul.f32 %v761_v63, %v2016_v6  ;;  %v780_v6 = vld [vmem:[%s2255_s30 + $0x10] sm:$0xff] }
 0x233   : > { %v774_v4 = vmul.f32 %v756_v1, %v2014_v5  ;;  %v1562_v8 = vpack.c.bf16 %v761_v63, %v756_v1  ;;  %v1476_v10 = vpop.f32.mrb[2].mxu1  ;;  %v779_v5 = vld [vmem:[%s2255_s30 + $0x8] sm:$0xff]  ;;  %v1047_v63 = vpop.permute.xlu0 %1046 }
 0x234   : > { %v771_v12 = vadd.f32 %v1476_v10, %v675_v3  ;;  %v765_v13 = vpop.f32.mrb[3].mxu1 }
 0x235   : > { %v766_v14 = vadd.f32 %v765_v13, %v670_v11  ;;  %v1546_v15 = vpack.c.bf16 %v775_v2, %v774_v4 }
 0x236   : > { %v777_v16 = vmul.f32 %v771_v12, %v2022_v9  ;;  %v1036_v9 = vld [vmem:[#allocation6] sm:$0xff] }
 0x237   : > { %v776_v17 = vmul.f32 %v766_v14, %v2018_v7  ;;  %v1566_v18 = vpack.c.bf16 %v771_v12, %v766_v14  ;;  %1547 = vmatprep.subr.bf16.mxu0 %v1546_v15  ;;  %v781_v7 = vld [vmem:[%s2255_s30 + $0x18] sm:$0xff]  ;;  %v1057_v11 = vpop.permute.xlu0 %1056 }
 0x238   : > { %1549 = vmatpush3.bf16.msra.mxu0 %v1546_v15 }
 0x239   : > { %v1550_v19 = vpack.c.bf16 %v777_v16, %v776_v17 }
 0x23b   : > { %1551 = vmatprep.subr.bf16.mxu0 %v1550_v19 }
 0x23c   : > { %1553 = vmatpush3.bf16.msra.mxu0 %v1550_v19 }
 0x23d   : > { %1563 = vmatprep.subr.bf16.mxu0 %v1562_v8 }
 0x23f   : > { %1486 = vmatmul.mubr.msk.f32.vlgmr.msra.gmra.mrb[4].mxu0 %vm547_vm0, %v779_v5  ;;  %v1166_v5 = vld [vmem:[%s2256_s24 + $0x8] sm:$0xff] }
 0x240   : > { %1565 = vmatpush3.bf16.msra.mxu0 %v1562_v8  ;;  %1488 = vmatprep.mubr.msk.f32.mxu0 %vm547_vm0, %v780_v6  ;;  %v1062_v8 = vpop.permute.xlu1 %1061 }
 0x241   : > { %1567 = vmatprep.subr.bf16.mxu0 %v1566_v18 }
 0x243   : > { %1489 = vmatmul.mubr.msk.f32.gmra.mrb[6].mxu0 %vm547_vm0, %v781_v7 }
 0x244   : > { %1569 = vmatpush3.bf16.msra.mxu0 %v1566_v18  ;;  %1513 = vmatprep.mubr.msk.f32.mxu0 %vm547_vm0, %v1036_v9  ;;  %v1177_v6 = vpop.permute.xlu1 %1176  ;;  %v1172_v9 = vpop.permute.xlu0 %1171 }
 0x247   : > { %1514 = vmatmul.mubr.msk.f32.vlgmr.msra.gmra.mrb[8].mxu0 %vm547_vm0, %v1037_v20 }
 0x248   : > { %1516 = vmatprep.mubr.msk.f32.mxu0 %vm547_vm0, %v1038_v21 }
 0x24b   : > { %1517 = vmatmul.mubr.msk.f32.gmra.mrb[10].mxu0 %vm547_vm0, %v1039_v22 }
 0x312   : > { %v1487_v26 = vpop.f32.mrb[4].mxu0 }
 0x313   : > { %v890_v27 = vadd.f32 %v1487_v26, %v794_v24  ;;  %v884_v28 = vpop.f32.mrb[5].mxu0 }
 0x314   : > { %v885_v29 = vadd.f32 %v884_v28, %v789_v25 }
 0x315   : > { %1654 = vtanh.f32 %v890_v27 }
 0x316   : > { %1656 = vtanh.f32 %v885_v29  ;;  %v1490_v31 = vpop.f32.mrb[6].mxu0 }
 0x317   : > { %v900_v33 = vadd.f32 %v1490_v31, %v804_v30  ;;  %v894_v34 = vpop.f32.mrb[7].mxu0 }
 0x318   : > { %v895_v35 = vadd.f32 %v894_v34, %v799_v32 }
 0x319   : > { %1658 = vtanh.f32 %v900_v33 }
 0x31a   : > { %1660 = vtanh.f32 %v895_v35  ;;  %v1515_v36 = vpop.f32.mrb[8].mxu0 }
 0x31b   : > { %v1142_v37 = vpop.f32.mrb[9].mxu0  ;;  %v1148_v0 = vadd.f32 %v1515_v36, %v1052_v62 }
 0x31c   : > { %v1143_v2 = vadd.f32 %v1142_v37, %v1047_v63 }
 0x31e   : > { %v1518_v38 = vpop.f32.mrb[10].mxu0 }
 0x31f   : > { %v1655_v39 = vpop.eup %1654  ;;  %v1152_v40 = vpop.f32.mrb[11].mxu0  ;;  %v1158_v12 = vadd.f32 %v1518_v38, %v1062_v8 }
 0x320   : > { %v1657_v41 = vpop.eup %1656  ;;  %v1153_v14 = vadd.f32 %v1152_v40, %v1057_v11 }
 0x321   : > { %v1554_v42 = vpack.c.bf16 %v1655_v39, %v1657_v41 }
 0x323   : > { %v1659_v43 = vpop.eup %1658  ;;  %1555 = vmatprep.subr.bf16.mxu1 %v1554_v42 }
 0x324   : > { %v1661_v44 = vpop.eup %1660  ;;  %1557 = vmatpush3.bf16.msra.mxu1 %v1554_v42 }
 0x325   : > { %v1558_v45 = vpack.c.bf16 %v1659_v43, %v1661_v44 }
 0x327   : > { %1559 = vmatprep.subr.bf16.mxu1 %v1558_v45 }
 0x328   : > { %1561 = vmatpush3.bf16.msra.mxu1 %v1558_v45 }
 0x32b   : > { %1500 = vmatmul.mubr.msk.f32.vlgmr.msra.gmra.mrb[4].mxu1 %vm547_vm0, %v908_v46 }
 0x32c   : > { %1502 = vmatprep.mubr.msk.f32.mxu1 %vm547_vm0, %v909_v47 }
 0x32f   : > { %1503 = vmatmul.mubr.msk.f32.gmra.mrb[6].mxu1 %vm547_vm0, %v910_v48 }
 0x330   : > { %1527 = vmatprep.mubr.msk.f32.mxu1 %vm547_vm0, %v1165_v49 }
 0x3fe   : > { %v1501_v52 = vpop.f32.mrb[4].mxu1 }
 0x3ff   : > { %v1019_v53 = vadd.f32 %v1501_v52, %v923_v50  ;;  %v1013_v54 = vpop.f32.mrb[5].mxu1 }
 0x400   : > { %v1014_v55 = vadd.f32 %v1013_v54, %v918_v51 }
 0x401   : > { %1662 = vtanh.f32 %v1019_v53 }
 0x402   : > { %1664 = vtanh.f32 %v1014_v55  ;;  %v1504_v58 = vpop.f32.mrb[6].mxu1 }
 0x403   : > { %v1029_v59 = vadd.f32 %v1504_v58, %v933_v56  ;;  %v1023_v60 = vpop.f32.mrb[7].mxu1 }
 0x404   : > { %v1024_v61 = vadd.f32 %v1023_v60, %v928_v57 }
 0x405   : > { %1666 = vtanh.f32 %v1029_v59 }
 0x406   : > { %1668 = vtanh.f32 %v1024_v61 }
 0x40b   : > { %v1663_v1 = vpop.eup %1662 }
 0x40c   : > { %v1665_v3 = vpop.eup %1664  ;;  %v1162_v4 = vmul.f32 %v1663_v1, %v1148_v0 }
 0x40d   : > { %v1161_v10 = vmul.f32 %v1665_v3, %v1143_v2 }
 0x40f   : > { %v1667_v13 = vpop.eup %1666  ;;  %v1570_v15 = vpack.c.bf16 %v1162_v4, %v1161_v10 }
 0x410   : > { %v1669_v16 = vpop.eup %1668  ;;  %v1164_v17 = vmul.f32 %v1667_v13, %v1158_v12 }
 0x411   : > { %1571 = vmatprep.subr.bf16.mxu1 %v1570_v15  ;;  %v1163_v18 = vmul.f32 %v1669_v16, %v1153_v14 }
 0x412   : > { %1573 = vmatpush3.bf16.msra.mxu1 %v1570_v15 }
 0x413   : > { %v1574_v19 = vpack.c.bf16 %v1164_v17, %v1163_v18 }
 0x415   : > { %1575 = vmatprep.subr.bf16.mxu1 %v1574_v19 }
 0x416   : > { %1577 = vmatpush3.bf16.msra.mxu1 %v1574_v19 }
 0x419   : > { %1528 = vmatmul.mubr.msk.f32.vlgmr.msra.gmra.mrb[8].mxu1 %vm547_vm0, %v1166_v5 }
 0x4ec   : > { %v1529_v7 = vpop.f32.mrb[8].mxu1 }
 0x4ed   : > { %v1257_v20 = vadd.f32 %v1529_v7, %v1177_v6  ;;  %v1251_v21 = vpop.f32.mrb[9].mxu1 }
 0x4ee   : > { %v1252_v22 = vadd.f32 %v1251_v21, %v1172_v9 }
 0x4ef   : > { %1261 = vst [vmem:[%s514_s21 + $0x8] sm:$0xff] %v1257_v20 }
 0x4f0   : > { %1260 = vst [vmem:[%s514_s21] sm:$0xff] %v1252_v22 }
 0x4f1   : > { %1739 = shalt.err (!%p1736_p1)
}
 0x4f2   : > { %s1740_s17 = scalar_lea.hbm %s2167_s25, 256  ;;  %s1744_s11 = scalar_lea.hbm %s2258_s13, 768 }
 0x4f3   : > { %p1741_p5 = scmp.ne.s32.totalorder %s2167_s25, %s1740_s17  ;;  %p1745_p6 = scmp.lt.u32.totalorder %s2167_s25, %s2258_s13 }
 0x4f4   : > { %p1746_p10 = scmp.lt.u32.totalorder %s1744_s11, %s1740_s17  ;;  %p1748_p12 = scmp.lt.u32.totalorder %s1740_s17, %s2167_s25 }
 0x4f5   : > { %p1742_p0 = pnand %p1741_p5, %p2259_p3 }
 0x4f6   : > { %p1747_p11 = por %p1746_p10, %p1745_p6 }
 0x4f7   : > { %p1743_p2 = pneg %p1742_p0 }
 0x4f8   : > { %p1749_p4 = por %p1748_p12, %p1747_p11 }
 0x4fa   : > { %p1750_p7 = pnand %p1749_p4, %p1743_p2 }
 0x4fc   : > { %1753 = shalt.err (!%p1750_p7)
}
 0x4fd   : > { %s1804_s29 = smov 128   ;;  %s1805_s22 = smov 384  }
 0x4fe   : > { %s1806_s15 = smov 8  }
 0x4ff   : > { %1586 = dma.vmem_to_hbm [thread:$0]  (%p2259_p3), %s2162_s23, 256, %s2167_s25, %s1263_s14, %s1804_s29, %s1805_s22, %s1806_s15  }
 0x500 PF: > { %s2260_s21 = sld [smem:[#allocation12_spill]]  ;;  %s2261_s5 = sld [smem:[#allocation16_spill]] }
 0x501   : > { %p1603_p8 = scmp.ge.s32.totalorder %s1796_s28, 2 }
 0x506   : > { %s1290_s11 = sand.u32 1, %s2260_s21   ;;  %p2262_p9 = scmp.ne.s32.totalorder %s2261_s5, 0 }
 0x507   : > { %s1291_s17 = scalar_lea.sflag [#allocation5], %s1290_s11 }
 0x508   : > { %p1596_p13 = pnand %p1603_p8, %p2262_p9 }
 0x50a   : > { %1779 = dma.done.wait (!%p1596_p13), %s1291_s17, 256  }
 0x50b   : > { %1781 = vsyncadd (!%p1596_p13), %s1291_s17, 4294967040  ;;  %s2263_s28 = sld [smem:[#allocation13_spill]]  ;;  %s2264_s19 = sld [smem:[#allocation14_spill]] }
 0x50c   : > { %s2265_s25 = smov %s1788_s26  ;;  %s2266_s26 = smov %s1792_s27 }
 0x511   : > { %p25_p1 = scmp.ge.s32.totalorder %s2263_s28, 5   ;;  %s2267_s27 = smov %s2264_s19 }
 0x513   :  { %27 = sbr.rel (!%p25_p1) target bundleno = 9 (0x9), region = 159 }
 0x51a   :  { %1296 = vsyncpa [#allocation4], 1 }
 0x51b   :  { %1298 = vsyncpa [#allocation4 + $0x1], 1 }
 0x51c   :  { %1299 = vsyncpa [#allocation7], 1 }
 0x51d   :  { %1300 = vsyncpa [#allocation5], 1 }
 0x51e   :  { %1302 = vsyncpa [#allocation5 + $0x1], 1 }

</bundles_post_ra>
